<compile_context>
chip_gen: v6e
topology: v6e:2x2x1
jax: 0.10.0
libtpu: 0.0.40
codegen_flags: <defaults>
</compile_context>

<pallas_src>
import jax
import jax.numpy as jnp
from jax.experimental import pallas as pl
from jax.experimental.pallas import tpu as pltpu

_LANE = 128
_VMEM_LIMIT = 32 * 1024 * 1024          # scoped-VMEM limit handed to Mosaic
_INPUT_VMEM_BUDGET = 16 * 1024 * 1024   # double-buffered input blocks (all gens)
_TEMP_CHUNK_BYTES = 512 * 1024          # cap on per-sub-chunk f32 temporaries


def _round_up(x, m):
    return ((x + m - 1) // m) * m


def _cdiv(a, b):
    return -(-a // b)


def _sublanes(dtype):
    # Sublane count of one (sublane, 128) register tile: f32->8, bf16->16, int8/bool->32.
    return max(8, 32 // max(1, jnp.dtype(dtype).itemsize))


def _auto_block_cols(n, total_cols, dtypes):
    """Largest multiple-of-128 column block whose double-buffered, sublane-padded
    input VMEM footprint stays within _INPUT_VMEM_BUDGET."""
    bytes_per_col = 0
    for dt in dtypes:
        dt = jnp.dtype(dt)
        bytes_per_col += _round_up(n, _sublanes(dt)) * dt.itemsize
    bc = (_INPUT_VMEM_BUDGET // (2 * bytes_per_col)) // _LANE * _LANE
    return int(max(_LANE, min(bc, _round_up(total_cols, _LANE))))


def _make_l1_kernel(num_pairs, n, total_cols, block_cols, blocks_per_split,
                    sub_cols, needs_mask):
    """Kernel over grid (num_splits, blocks_per_split).

    refs = [gt_0, pred_0, ..., gt_{P-1}, pred_{P-1}, mask, out_0, ..., out_{P-1}]
    Data refs are (n, block_cols) VMEM views of the flat (n, L) inputs; out refs
    are (n, 1) float32 partial-sum blocks resident across the reduction axis.
    """
    def kernel(*refs):
        in_refs = refs[:2 * num_pairs + 1]
        out_refs = refs[2 * num_pairs + 1:]
        mask_ref = in_refs[2 * num_pairs]

        s = pl.program_id(0)      # parallel split of the reduction (megacore)
        r = pl.program_id(1)      # reduction steps inside this split

        @pl.when(r == 0)
        def _init():
            for o in out_refs:
                o[...] = jnp.zeros_like(o)

        if needs_mask:
            # Unclamped global column offset of this block (for tail masking).
            block_start = (s * blocks_per_split + r) * block_cols

        totals = [jnp.zeros((n, 1), jnp.float32) for _ in range(num_pairs)]
        # Process the block in lane-aligned sub-chunks so compiler temporaries
        # stay small regardless of block_cols (static slices of refs are free).
        for c0 in range(0, block_cols, sub_cols):
            c1 = min(c0 + sub_cols, block_cols)
            sl = slice(c0, c1)
            m = mask_ref[:, sl].astype(jnp.float32)
            valid = None
            if needs_mask:
                col = block_start + c0 + jax.lax.broadcasted_iota(
                    jnp.int32, (n, c1 - c0), 1)
                valid = col < total_cols
            for p in range(num_pairs):
                gt = in_refs[2 * p][:, sl].astype(jnp.float32)
                pr = in_refs[2 * p + 1][:, sl].astype(jnp.float32)
                contrib = m * jnp.abs(pr - gt)
                if needs_mask:
                    # Select, not multiply: out-of-range lanes may hold garbage
                    # (NaN/Inf) that 0 * x would propagate.
                    contrib = jnp.where(valid, contrib, 0.0)
                totals[p] = totals[p] + jnp.sum(contrib, axis=-1, keepdims=True)

        # One narrow (n, 1) accumulate per pair per step -- negligible next to
        # the multi-MiB streaming DMA of each grid step.
        for p in range(num_pairs):
            out_refs[p][...] += totals[p]

    return kernel


def _l1_mask_losses(pairs, mask, *, block_cols=None, num_splits=None):
    """Fused L1MaskLoss over a single shared mask.

    pairs: sequence of (gt, pred) 4-D NCHW arrays, all the same shape as `mask`.
    Returns one (N, 1) per-sample loss per pair:
        (mask * |pred - gt|).mean(-1).mean(-1).mean(-1, keepdims=True)

    Recommended low-HBM calling convention: bf16 gt/pred + int8 (or bool) mask;
    accumulation is float32 in-kernel either way.
    """
    shape = mask.shape
    assert mask.ndim == 4, "expected NCHW inputs"
    for gt, pred in pairs:
        assert gt.shape == shape and pred.shape == shape
    n, c, h, w = shape
    total_cols = c * h * w
    num_pairs = len(pairs)

    # Flat (N, L) views: pure reshape of contiguous data -- no pad, no HBM copy.
    flat_inputs, dtypes = [], []
    for gt, pred in pairs:
        flat_inputs += [gt.reshape(n, total_cols), pred.reshape(n, total_cols)]
        dtypes += [gt.dtype, pred.dtype]
    flat_inputs.append(mask.reshape(n, total_cols))
    dtypes.append(mask.dtype)

    if block_cols is None:
        block_cols = _auto_block_cols(n, total_cols, dtypes)
    # The batch axis is the (full-extent) sublane axis, so only the lane-width
    # constraint applies to the streamed dimension.
    assert block_cols > 0 and block_cols % _LANE == 0, \
        "block_cols must be a positive multiple of 128"

    num_blocks = _cdiv(total_cols, block_cols)
    if num_splits is None:
        num_splits = 2 if num_blocks >= 2 else 1      # keep both v7x TCs busy
    num_splits = max(1, min(int(num_splits), num_blocks))
    blocks_per_split = _cdiv(num_blocks, num_splits)
    # Tail masking is needed whenever the grid covers more columns than L
    # (ragged last block and/or clamped overhang steps).
    needs_mask = (num_splits * blocks_per_split * block_cols != total_cols)

    # Sub-chunk width keeping per-op f32 temporaries around <=512 KiB.
    sub_cols = (_TEMP_CHUNK_BYTES // (_round_up(n, 8) * 4)) // _LANE * _LANE
    sub_cols = int(max(_LANE, min(sub_cols, block_cols)))

    kernel = _make_l1_kernel(num_pairs, n, total_cols, block_cols,
                             blocks_per_split, sub_cols, needs_mask)

    def data_index(s, r):
        # Clamp overhang steps to the last real block; Pallas skips the copy
        # when the block index is unchanged, so clamped steps add no HBM traffic.
        return (0, jnp.minimum(s * blocks_per_split + r, num_blocks - 1))

    data_spec = pl.BlockSpec((n, block_cols), data_index)
    out_spec = pl.BlockSpec((pl.Squeezed(), n, 1), lambda s, r: (s, 0, 0))

    partials = pl.pallas_call(
        kernel,
        out_shape=tuple(jax.ShapeDtypeStruct((num_splits, n, 1), jnp.float32)
                        for _ in range(num_pairs)),
        grid=(num_splits, blocks_per_split),
        in_specs=[data_spec] * (2 * num_pairs + 1),
        out_specs=tuple([out_spec] * num_pairs),
        compiler_params=pltpu.CompilerParams(
            dimension_semantics=("parallel", "arbitrary"),
            vmem_limit_bytes=_VMEM_LIMIT,
        ),
    )(*flat_inputs)

    if not isinstance(partials, (tuple, list)):
        partials = (partials,)

    inv_count = 1.0 / float(total_cols)   # == chained equal-size means over W,H,C
    outs = []
    for (gt, pred), part in zip(pairs, partials):
        out_dtype = jnp.result_type(gt.dtype, pred.dtype)
        outs.append((part.sum(axis=0) * inv_count).astype(out_dtype))
    return outs


def l1_mask_loss(gt, pred, mask, **kwargs):
    """L1MaskLoss.forward(gt, pred, mask) -> (N, 1)."""
    return _l1_mask_losses([(gt, pred)], mask, **kwargs)[0]


def fused_l1_mask_losses(gt_off, pred_off, gt_size, pred_size, mask, **kwargs):
    """Both CenterNet regression losses in one HBM pass (mask streamed once)."""
    off, size = _l1_mask_losses(
        [(gt_off, pred_off), (gt_size, pred_size)], mask, **kwargs)
    return off, size


def _focal_loss_mean(pred_probs, gt_idx, *, gamma=4.0, alpha=2.0, eps=1e-8):
    # TODO(synk): ORGFocalLoss wraps the external `focal_loss` pip package; its
    # exact alpha / ignore_index semantics are not reproducible here, so the
    # heat-map head uses the standard focal-loss formula in plain JAX rather
    # than a Pallas kernel (it is tiny next to the regression losses).
    p_t = jnp.take_along_axis(pred_probs, gt_idx[:, None, ...], axis=1)[:, 0]
    p_t = jnp.clip(p_t, eps, 1.0)
    return jnp.mean(alpha * (1.0 - p_t) ** gamma * (-jnp.log(p_t)))


def centernet_loss(gt_list, pred_list, mask, *, size_factor=0.1,
                   offset_factor=1.0, block_cols=None):
    """CenternetLoss.forward(gt_list, pred_list, mask)."""
    offset_loss, size_loss = fused_l1_mask_losses(
        gt_list[1], pred_list[1], gt_list[2], pred_list[2], mask,
        block_cols=block_cols)
    heat_loss = _focal_loss_mean(pred_list[0], gt_list[0])
    total = (heat_loss + offset_factor * offset_loss.mean()
             + size_factor * size_loss.mean())
    return total, heat_loss, offset_loss, size_loss


if __name__ == "__main__":
    key = jax.random.PRNGKey(0)
    ks = jax.random.split(key, 10)

    def ref_l1(g, p, m):
        g, p, m = (x.astype(jnp.float32) for x in (g, p, m))
        out = m * jnp.abs(p - g)
        return out.mean(axis=-1).mean(axis=-1).mean(axis=-1, keepdims=True)

    # ---- Case 1: f32 inputs, shared mask, fused offset+size losses ----------
    N, C, H, W = 2, 4, 16, 16          # L = 1024 (lane aligned, single block)
    C_CLS = 3
    gt_off = jax.random.normal(ks[0], (N, C, H, W), jnp.float32)
    pred_off = jax.random.normal(ks[1], (N, C, H, W), jnp.float32)
    gt_size = jax.random.normal(ks[2], (N, C, H, W), jnp.float32)
    pred_size = jax.random.normal(ks[3], (N, C, H, W), jnp.float32)
    mask_f32 = (jax.random.uniform(ks[4], (N, C, H, W)) > 0.5).astype(jnp.float32)
    mask_i8 = mask_f32.astype(jnp.int8)   # 1-byte mask: recommended convention

    off, size = fused_l1_mask_losses(gt_off, pred_off, gt_size, pred_size, mask_f32)
    jax.block_until_ready((off, size))
    ref_off = ref_l1(gt_off, pred_off, mask_f32)
    ref_size = ref_l1(gt_size, pred_size, mask_f32)
    assert off.shape == (N, 1) and size.shape == (N, 1)
    assert jnp.allclose(off, ref_off, atol=1e-5, rtol=1e-5)
    assert jnp.allclose(size, ref_size, atol=1e-5, rtol=1e-5)

    # int8 mask path gives the identical result.
    off_i8, size_i8 = fused_l1_mask_losses(gt_off, pred_off, gt_size, pred_size, mask_i8)
    jax.block_until_ready((off_i8, size_i8))
    assert jnp.allclose(off_i8, ref_off, atol=1e-5, rtol=1e-5)
    assert jnp.allclose(size_i8, ref_size, atol=1e-5, rtol=1e-5)

    # ---- Case 2: ragged C*H*W (not a multiple of 128), forced small blocks --
    # Exercises the in-kernel tail mask, multi-block reduction, the 2-way
    # parallel split and the clamped overhang block -- all with NO jnp.pad.
    N2, C2, H2, W2 = 2, 3, 20, 20      # L = 1200
    g2 = jax.random.normal(ks[5], (N2, C2, H2, W2), jnp.float32)
    p2 = jax.random.normal(ks[6], (N2, C2, H2, W2), jnp.float32)
    m2 = (jax.random.uniform(ks[7], (N2, C2, H2, W2)) > 0.3).astype(jnp.float32)
    o2 = l1_mask_loss(g2, p2, m2, block_cols=256)     # 5 blocks -> 2 splits of 3
    jax.block_until_ready(o2)
    assert jnp.allclose(o2, ref_l1(g2, p2, m2), atol=1e-5, rtol=1e-5)

    # ---- Case 3: bf16 gt/pred + int8 mask (low-HBM convention), f32 accum ---
    o_bf = l1_mask_loss(gt_off.astype(jnp.bfloat16),
                        pred_off.astype(jnp.bfloat16), mask_i8)
    jax.block_until_ready(o_bf)
    ref_bf = ref_l1(gt_off.astype(jnp.bfloat16),
                    pred_off.astype(jnp.bfloat16), mask_f32)
    assert jnp.allclose(o_bf.astype(jnp.float32), ref_bf, atol=1e-2, rtol=1e-2)

    # ---- Case 4: full CenternetLoss forward ----------------------------------
    heat_pred = jax.nn.softmax(
        jax.random.normal(ks[8], (N, C_CLS, H, W), jnp.float32), axis=1)
    heat_gt = jax.random.randint(ks[9], (N, H, W), 0, C_CLS)
    total, heat_loss, offset_loss, size_loss = centernet_loss(
        (heat_gt, gt_off, gt_size), (heat_pred, pred_off, pred_size), mask_i8)
    jax.block_until_ready(total)
    assert total.shape == () and heat_loss.shape == ()
    assert jnp.allclose(offset_loss, ref_off, atol=1e-5, rtol=1e-5)
    assert jnp.allclose(size_loss, ref_size, atol=1e-5, rtol=1e-5)

    print("KERNEL_OK")
</pallas_src>

<mosaic_0001>
module attributes {stable_mosaic.version = 11 : i64} {
  func.func @kernel(%arg0: i32, %arg1: i32, %arg2: memref<2x1024xf32, #tpu.memory_space<vmem>>, %arg3: memref<2x1024xf32, #tpu.memory_space<vmem>>, %arg4: memref<2x1024xf32, #tpu.memory_space<vmem>>, %arg5: memref<2x1024xf32, #tpu.memory_space<vmem>>, %arg6: memref<2x1024xf32, #tpu.memory_space<vmem>>, %arg7: memref<1x2x1xf32, #tpu.memory_space<vmem>>, %arg8: memref<1x2x1xf32, #tpu.memory_space<vmem>>) attributes {dimension_semantics = [#tpu.dimension_semantics<parallel>, #tpu.dimension_semantics<arbitrary>], iteration_bounds = array<i64: 1, 1>, scalar_prefetch = 0 : i64, scratch_operands = 0 : i64, tpu.core_type = #tpu.core_type<tc>, window_params = [{transform_indices = @transform_0, window_bounds = array<i64: 2, 1024>}, {transform_indices = @transform_1, window_bounds = array<i64: 2, 1024>}, {transform_indices = @transform_2, window_bounds = array<i64: 2, 1024>}, {transform_indices = @transform_3, window_bounds = array<i64: 2, 1024>}, {transform_indices = @transform_4, window_bounds = array<i64: 2, 1024>}, {transform_indices = @transform_5, window_bounds = array<i64: 1, 2, 1>}, {transform_indices = @transform_6, window_bounds = array<i64: 1, 2, 1>}]} {
    %c0_i32 = arith.constant 0 : i32
    %0 = arith.cmpi eq, %arg1, %c0_i32 : i32
    %1 = arith.extui %0 : i1 to i32
    %c0_i32_0 = arith.constant 0 : i32
    %2 = arith.cmpi ne, %1, %c0_i32_0 : i32
    scf.if %2 {
      %cst_25 = arith.constant 0.000000e+00 : f32
      %34 = vector.broadcast %cst_25 : f32 to vector<2x1xf32>
      %c0_26 = arith.constant 0 : index
      %c0_27 = arith.constant 0 : index
      %c0_28 = arith.constant 0 : index
      %35 = vector.load %arg7[%c0_26, %c0_27, %c0_28] : memref<1x2x1xf32, #tpu.memory_space<vmem>>, vector<1x2x1xf32>
      %36 = vector.shape_cast %35 : vector<1x2x1xf32> to vector<2x1xf32>
      %37 = vector.shape_cast %34 : vector<2x1xf32> to vector<1x2x1xf32>
      tpu.vector_store %arg7[%c0_26, %c0_27, %c0_28], %37 {strides = array<i32>} : memref<1x2x1xf32, #tpu.memory_space<vmem>>, vector<1x2x1xf32>,
      %cst_29 = arith.constant 0.000000e+00 : f32
      %38 = vector.broadcast %cst_29 : f32 to vector<2x1xf32>
      %c0_30 = arith.constant 0 : index
      %c0_31 = arith.constant 0 : index
      %c0_32 = arith.constant 0 : index
      %39 = vector.load %arg8[%c0_30, %c0_31, %c0_32] : memref<1x2x1xf32, #tpu.memory_space<vmem>>, vector<1x2x1xf32>
      %40 = vector.shape_cast %39 : vector<1x2x1xf32> to vector<2x1xf32>
      %41 = vector.shape_cast %38 : vector<2x1xf32> to vector<1x2x1xf32>
      tpu.vector_store %arg8[%c0_30, %c0_31, %c0_32], %41 {strides = array<i32>} : memref<1x2x1xf32, #tpu.memory_space<vmem>>, vector<1x2x1xf32>,
    } else {
    }
    %cst = arith.constant 0.000000e+00 : f32
    %3 = vector.broadcast %cst : f32 to vector<2x1xf32>
    %cst_1 = arith.constant 0.000000e+00 : f32
    %4 = vector.broadcast %cst_1 : f32 to vector<2x1xf32>
    %c0 = arith.constant 0 : index
    %c0_2 = arith.constant 0 : index
    %5 = vector.load %arg6[%c0, %c0_2] : memref<2x1024xf32, #tpu.memory_space<vmem>>, vector<2x1024xf32>
    %c0_3 = arith.constant 0 : index
    %c0_4 = arith.constant 0 : index
    %6 = vector.load %arg2[%c0_3, %c0_4] : memref<2x1024xf32, #tpu.memory_space<vmem>>, vector<2x1024xf32>
    %c0_5 = arith.constant 0 : index
    %c0_6 = arith.constant 0 : index
    %7 = vector.load %arg3[%c0_5, %c0_6] : memref<2x1024xf32, #tpu.memory_space<vmem>>, vector<2x1024xf32>
    %8 = arith.subf %7, %6 : vector<2x1024xf32>
    %9 = math.absf %8 : vector<2x1024xf32>
    %10 = arith.mulf %5, %9 : vector<2x1024xf32>
    %cst_7 = arith.constant dense<0.000000e+00> : vector<2xf32>
    %11 = vector.multi_reduction <add>, %10, %cst_7 [1] : vector<2x1024xf32> to vector<2xf32>
    %12 = vector.shape_cast %11 : vector<2xf32> to vector<2x1xf32>
    %13 = arith.addf %3, %12 : vector<2x1xf32>
    %c0_8 = arith.constant 0 : index
    %c0_9 = arith.constant 0 : index
    %14 = vector.load %arg4[%c0_8, %c0_9] : memref<2x1024xf32, #tpu.memory_space<vmem>>, vector<2x1024xf32>
    %c0_10 = arith.constant 0 : index
    %c0_11 = arith.constant 0 : index
    %15 = vector.load %arg5[%c0_10, %c0_11] : memref<2x1024xf32, #tpu.memory_space<vmem>>, vector<2x1024xf32>
    %16 = arith.subf %15, %14 : vector<2x1024xf32>
    %17 = math.absf %16 : vector<2x1024xf32>
    %18 = arith.mulf %5, %17 : vector<2x1024xf32>
    %cst_12 = arith.constant dense<0.000000e+00> : vector<2xf32>
    %19 = vector.multi_reduction <add>, %18, %cst_12 [1] : vector<2x1024xf32> to vector<2xf32>
    %20 = vector.shape_cast %19 : vector<2xf32> to vector<2x1xf32>
    %21 = arith.addf %4, %20 : vector<2x1xf32>
    %c0_13 = arith.constant 0 : index
    %c0_14 = arith.constant 0 : index
    %c0_15 = arith.constant 0 : index
    %22 = vector.load %arg7[%c0_13, %c0_14, %c0_15] : memref<1x2x1xf32, #tpu.memory_space<vmem>>, vector<1x2x1xf32>
    %23 = vector.shape_cast %22 : vector<1x2x1xf32> to vector<2x1xf32>
    %24 = arith.addf %23, %13 : vector<2x1xf32>
    %c0_16 = arith.constant 0 : index
    %c0_17 = arith.constant 0 : index
    %c0_18 = arith.constant 0 : index
    %25 = vector.load %arg7[%c0_16, %c0_17, %c0_18] : memref<1x2x1xf32, #tpu.memory_space<vmem>>, vector<1x2x1xf32>
    %26 = vector.shape_cast %25 : vector<1x2x1xf32> to vector<2x1xf32>
    %27 = vector.shape_cast %24 : vector<2x1xf32> to vector<1x2x1xf32>
    tpu.vector_store %arg7[%c0_16, %c0_17, %c0_18], %27 {strides = array<i32>} : memref<1x2x1xf32, #tpu.memory_space<vmem>>, vector<1x2x1xf32>,
    %c0_19 = arith.constant 0 : index
    %c0_20 = arith.constant 0 : index
    %c0_21 = arith.constant 0 : index
    %28 = vector.load %arg8[%c0_19, %c0_20, %c0_21] : memref<1x2x1xf32, #tpu.memory_space<vmem>>, vector<1x2x1xf32>
    %29 = vector.shape_cast %28 : vector<1x2x1xf32> to vector<2x1xf32>
    %30 = arith.addf %29, %21 : vector<2x1xf32>
    %c0_22 = arith.constant 0 : index
    %c0_23 = arith.constant 0 : index
    %c0_24 = arith.constant 0 : index
    %31 = vector.load %arg8[%c0_22, %c0_23, %c0_24] : memref<1x2x1xf32, #tpu.memory_space<vmem>>, vector<1x2x1xf32>
    %32 = vector.shape_cast %31 : vector<1x2x1xf32> to vector<2x1xf32>
    %33 = vector.shape_cast %30 : vector<2x1xf32> to vector<1x2x1xf32>
    tpu.vector_store %arg8[%c0_22, %c0_23, %c0_24], %33 {strides = array<i32>} : memref<1x2x1xf32, #tpu.memory_space<vmem>>, vector<1x2x1xf32>,
    return
  }
  func.func @transform_0(%arg0: i32, %arg1: i32) -> (i32, i32) {
    %c1_i32 = arith.constant 1 : i32
    %0 = arith.muli %arg0, %c1_i32 : i32
    %1 = arith.addi %0, %arg1 : i32
    %c0_i32 = arith.constant 0 : i32
    %2 = arith.minsi %1, %c0_i32 : i32
    %c0_i32_0 = arith.constant 0 : i32
    %c0_i32_1 = arith.constant 0 : i32
    return %c0_i32_0, %2 : i32, i32
  }
  func.func @transform_1(%arg0: i32, %arg1: i32) -> (i32, i32) {
    %c1_i32 = arith.constant 1 : i32
    %0 = arith.muli %arg0, %c1_i32 : i32
    %1 = arith.addi %0, %arg1 : i32
    %c0_i32 = arith.constant 0 : i32
    %2 = arith.minsi %1, %c0_i32 : i32
    %c0_i32_0 = arith.constant 0 : i32
    %c0_i32_1 = arith.constant 0 : i32
    return %c0_i32_0, %2 : i32, i32
  }
  func.func @transform_2(%arg0: i32, %arg1: i32) -> (i32, i32) {
    %c1_i32 = arith.constant 1 : i32
    %0 = arith.muli %arg0, %c1_i32 : i32
    %1 = arith.addi %0, %arg1 : i32
    %c0_i32 = arith.constant 0 : i32
    %2 = arith.minsi %1, %c0_i32 : i32
    %c0_i32_0 = arith.constant 0 : i32
    %c0_i32_1 = arith.constant 0 : i32
    return %c0_i32_0, %2 : i32, i32
  }
  func.func @transform_3(%arg0: i32, %arg1: i32) -> (i32, i32) {
    %c1_i32 = arith.constant 1 : i32
    %0 = arith.muli %arg0, %c1_i32 : i32
    %1 = arith.addi %0, %arg1 : i32
    %c0_i32 = arith.constant 0 : i32
    %2 = arith.minsi %1, %c0_i32 : i32
    %c0_i32_0 = arith.constant 0 : i32
    %c0_i32_1 = arith.constant 0 : i32
    return %c0_i32_0, %2 : i32, i32
  }
  func.func @transform_4(%arg0: i32, %arg1: i32) -> (i32, i32) {
    %c1_i32 = arith.constant 1 : i32
    %0 = arith.muli %arg0, %c1_i32 : i32
    %1 = arith.addi %0, %arg1 : i32
    %c0_i32 = arith.constant 0 : i32
    %2 = arith.minsi %1, %c0_i32 : i32
    %c0_i32_0 = arith.constant 0 : i32
    %c0_i32_1 = arith.constant 0 : i32
    return %c0_i32_0, %2 : i32, i32
  }
  func.func @transform_5(%arg0: i32, %arg1: i32) -> (i32, i32, i32) {
    %c0_i32 = arith.constant 0 : i32
    %c0_i32_0 = arith.constant 0 : i32
    %c0_i32_1 = arith.constant 0 : i32
    return %arg0, %c0_i32, %c0_i32_0 : i32, i32, i32
  }
  func.func @transform_6(%arg0: i32, %arg1: i32) -> (i32, i32, i32) {
    %c0_i32 = arith.constant 0 : i32
    %c0_i32_0 = arith.constant 0 : i32
    %c0_i32_1 = arith.constant 0 : i32
    return %arg0, %c0_i32, %c0_i32_0 : i32, i32, i32
  }
}

</mosaic_0001>

<bundles_post_ra>
// kernel: tpu_custom_call.1
= control target key start
LH: loop header
LB: loop body
LE: loop exit
PB: predicated region body
PF: predicated region fallthrough
CT: control target
= control target key end

     0   :  { %12 = vsyncpa [#allocation3], 0  ;;  %s520_s0 = inlined_call_operand.hbm [shape: f32[2,1024], index: 0, kind: input, shape index: {}]   ;;  %s521_s1 = inlined_call_operand.hbm [shape: f32[2,1024], index: 1, kind: input, shape index: {}]   ;;  %s522_s2 = inlined_call_operand.hbm [shape: f32[2,1024], index: 2, kind: input, shape index: {}]   ;;  %s523_s3 = inlined_call_operand.hbm [shape: f32[2,1024], index: 3, kind: input, shape index: {}]   ;;  %s524_s4 = inlined_call_operand.hbm [shape: f32[2,1024], index: 4, kind: input, shape index: {}]   ;;  %s525_s5 = inlined_call_operand.vmem [shape: f32[1,2,1], index: 5, kind: output, shape index: {0}]   ;;  %s526_s6 = inlined_call_operand.vmem [shape: f32[1,2,1], index: 6, kind: output, shape index: {1}]  }
   0x1   :  { %13 = vsyncpa [#allocation5], 0 }
   0x2   :  { %14 = vsyncpa [#allocation8], 0  ;;  %s425_s21 = smov [#allocation4]   ;;  %s426_s23 = smov [#allocation7]  }
   0x3   :  { %s43_s22 = sshll.u32 %s425_s21, 4  ;;  %s75_s24 = sshll.u32 %s426_s23, 4  ;;  %s44_s22 = int_to_ptr.vmem [resolvable:$true] %s43_s22  ;;  %s76_s24 = int_to_ptr.vmem [resolvable:$true] %s75_s24 }
   0x4   :  { %s327_s25 = scalar_lea.vmem %s44_s22, 256  ;;  %p332_p1 = scmp.lt.s32.totalorder %s44_s22, %s44_s22 }
   0x5   :  { %p328_p0 = scmp.ne.s32.totalorder %s44_s22, %s327_s25  ;;  %p333_p2 = scmp.lt.s32.totalorder %s327_s25, %s327_s25 }
   0x7   :  { %p334_p3 = por %p333_p2, %p332_p1 }
   0x9   :  { %p335_p4 = pnand %p334_p3, %p328_p0 }
   0xb   :  { %338 = shalt.err (!%p335_p4)
}
   0xc   :  { %46 = dma.hbm_to_vmem [thread:$0]  %s521_s1, 256, %s44_s22, [#allocation5]  }
   0xd   :  { %s347_s28 = scalar_lea.vmem %s76_s24, 256  ;;  %p352_p6 = scmp.lt.s32.totalorder %s76_s24, %s76_s24 }
   0xe   :  { %p348_p5 = scmp.ne.s32.totalorder %s76_s24, %s347_s28  ;;  %p353_p7 = scmp.lt.s32.totalorder %s347_s28, %s347_s28 }
  0x10   :  { %p354_p8 = por %p353_p7, %p352_p6 }
  0x12   :  { %p355_p9 = pnand %p354_p8, %p348_p5 }
  0x14   :  { %358 = shalt.err (!%p355_p9)
}
  0x15   :  { %78 = dma.hbm_to_vmem [thread:$0]  %s523_s3, 256, %s76_s24, [#allocation8]  }
  0x16   :  { %s427_s7 = smov [#allocation2]   ;;  %s428_s9 = smov [#allocation6]  }
  0x17   :  { %s27_s8 = sshll.u32 %s427_s7, 4  ;;  %s59_s10 = sshll.u32 %s428_s9, 4  ;;  %s28_s8 = int_to_ptr.vmem [resolvable:$true] %s27_s8  ;;  %s60_s10 = int_to_ptr.vmem [resolvable:$true] %s59_s10 }
  0x18   :  { %s367_s11 = scalar_lea.vmem %s28_s8, 256  ;;  %p372_p11 = scmp.lt.s32.totalorder %s28_s8, %s28_s8 }
  0x19   :  { %p368_p10 = scmp.ne.s32.totalorder %s28_s8, %s367_s11  ;;  %p373_p12 = scmp.lt.s32.totalorder %s367_s11, %s367_s11 }
  0x1b   :  { %p374_p13 = por %p373_p12, %p372_p11 }
  0x1d   :  { %p375_p0 = pnand %p374_p13, %p368_p10 }
  0x1f   :  { %378 = shalt.err (!%p375_p0)
}
  0x20   :  { %30 = dma.hbm_to_vmem [thread:$0]  %s520_s0, 256, %s28_s8, [#allocation3]  }
  0x21   :  { %s387_s13 = scalar_lea.vmem %s60_s10, 256  ;;  %p392_p2 = scmp.lt.s32.totalorder %s60_s10, %s60_s10 }
  0x22   :  { %p388_p1 = scmp.ne.s32.totalorder %s60_s10, %s387_s13  ;;  %p393_p3 = scmp.lt.s32.totalorder %s387_s13, %s387_s13 }
  0x24   :  { %p394_p4 = por %p393_p3, %p392_p2 }
  0x26   :  { %p395_p5 = pnand %p394_p4, %p388_p1 }
  0x28   :  { %398 = shalt.err (!%p395_p5)
}
  0x29   :  { %62 = dma.hbm_to_vmem [thread:$0]  %s522_s2, 256, %s60_s10, [#allocation5]  }
  0x2a   :  { %s429_s15 = smov [#allocation9]  }
  0x2b   :  { %s91_s16 = sshll.u32 %s429_s15, 4  ;;  %s92_s16 = int_to_ptr.vmem [resolvable:$true] %s91_s16 }
  0x2c   :  { %s407_s17 = scalar_lea.vmem %s92_s16, 256  ;;  %p412_p7 = scmp.lt.s32.totalorder %s92_s16, %s92_s16 }
  0x2d   :  { %p408_p6 = scmp.ne.s32.totalorder %s92_s16, %s407_s17  ;;  %p413_p8 = scmp.lt.s32.totalorder %s407_s17, %s407_s17 }
  0x2f   :  { %p414_p9 = por %p413_p8, %p412_p7 }
  0x31   :  { %p415_p10 = pnand %p414_p9, %p408_p6 }
  0x33   :  { %418 = shalt.err (!%p415_p10)
}
  0x34   :  { %94 = dma.hbm_to_vmem [thread:$0]  %s524_s4, 256, %s92_s16, [#allocation8]  }
  0x35   :  { %419 = dma.done.wait [#allocation3], 256  }
  0x36   :  { %420 = vsyncadd [#allocation3], 4294967040 }
  0x37   :  { %421 = dma.done.wait [#allocation5], 512  }
  0x38   :  { %422 = vsyncadd [#allocation5], 4294966784 }
  0x39   :  { %423 = dma.done.wait [#allocation8], 512  }
  0x3a   :  { %424 = vsyncadd [#allocation8], 4294966784  ;;  %vm134_vm0 = vcmask 1024   ;;  %v430_v0 = vmov 0.0   ;;  %v431_v1 = vmov 1983009808   ;;  %v155_v3 = vlaneseq }
  0x3b   :  { %135 = vst.msk [vmem:[%s525_s5] sm:$0x3] %vm134_vm0, %v430_v0  ;;  %136 = vst.msk [vmem:[%s526_s6] sm:$0x3] %vm134_vm0, %v430_v0  ;;  %v153_v2 = vunpack.c.l.s4 %v431_v1  ;;  %v139_v4 = vld [vmem:[#allocation2] sm:$0xff]  ;;  %v140_v7 = vld [vmem:[#allocation2 + $0x8] sm:$0xff] }
  0x3c   :  { %v156_v6 = vshrl.u32 %v155_v3, 7  ;;  %v141_v8 = vld [vmem:[#allocation4] sm:$0xff]  ;;  %v142_v9 = vld [vmem:[#allocation4 + $0x8] sm:$0xff]  ;;  %v212_v12 = vld [vmem:[#allocation6] sm:$0xff]  ;;  %vm193_vm1 = vcmask 1041408  }
  0x3d   :  { %v154_v5 = vunpack.c.0.s8 %v153_v2  ;;  %v143_v10 = vsub.f32 %v141_v8, %v139_v4  ;;  %v144_v11 = vsub.f32 %v142_v9, %v140_v7  ;;  %v213_v13 = vld [vmem:[#allocation6 + $0x8] sm:$0xff]  ;;  %v214_v14 = vld [vmem:[#allocation7] sm:$0xff]  ;;  %v137_v15 = vld [vmem:[#allocation9] sm:$0xff] }
  0x3e   :  { %v138_v16 = vld [vmem:[#allocation9 + $0x8] sm:$0xff]  ;;  %v215_v17 = vld [vmem:[#allocation7 + $0x8] sm:$0xff]  ;;  %v216_v18 = vsub.f32 %v214_v14, %v212_v12 }
  0x3f   :  { %v145_v19 = vand.u32 2147483647, %v143_v10  ;;  %v146_v20 = vand.u32 2147483647, %v144_v11  ;;  %v157_v21 = vsub.s32 %v154_v5, %v156_v6  ;;  %v217_v22 = vsub.f32 %v215_v17, %v213_v13 }
  0x40   :  { %v218_v23 = vand.u32 2147483647, %v216_v18 }
  0x41   :  { %v147_v24 = vmul.f32 %v145_v19, %v137_v15  ;;  %v148_v25 = vmul.f32 %v146_v20, %v138_v16  ;;  %v219_v26 = vand.u32 2147483647, %v217_v22 }
  0x42   :  { %v220_v27 = vmul.f32 %v218_v23, %v137_v15  ;;  %v284_v15 = vld [vmem:[%s525_s5] sm:$0x3] }
  0x43   :  { %v151_v28 = vcombine.high %v147_v24, %v147_v24  ;;  %v158_v29 = vrot.slane %v147_v24, %v157_v21  ;;  %v168_v30 = vcombine.high %v148_v25, %v148_v25  ;;  %v175_v35 = vrot.slane %v148_v25, %v157_v21  ;;  %v288_v18 = vld [vmem:[%s526_s6] sm:$0x3] }
  0x44   :  { %v224_v31 = vcombine.high %v220_v27, %v220_v27  ;;  %v231_v32 = vrot.slane %v220_v27, %v157_v21  ;;  %v221_v36 = vmul.f32 %v219_v26, %v138_v16 }
  0x45   :  { %v165_v33 = vrot.slane %v151_v28, %v157_v21  ;;  %v166_v34 = vcombine.high %v158_v29, %v158_v29  ;;  %v194_v37 = vsel %vm193_vm1, %v158_v29, 0.0  ;;  %v182_v43 = vrot.slane %v168_v30, %v157_v21 }
  0x46   :  { %v238_v38 = vrot.slane %v224_v31, %v157_v21  ;;  %v239_v39 = vcombine.high %v231_v32, %v231_v32  ;;  %v183_v46 = vcombine.high %v175_v35, %v175_v35  ;;  %v241_v48 = vcombine.high %v221_v36, %v221_v36 }
  0x47   :  { %v167_v40 = vcombine.high %v165_v33, %v165_v33  ;;  %v195_v41 = vsel %vm193_vm1, %v166_v34, 0.0  ;;  %v197_v42 = vsel %vm193_vm1, %v165_v33, 0.0  ;;  %v248_v49 = vrot.slane %v221_v36, %v157_v21 }
  0x48   :  { %v196_v44 = vadd.f32 %v195_v41, %v194_v37  ;;  %v240_v45 = vcombine.high %v238_v38, %v238_v38  ;;  %v266_v51 = vsel %vm193_vm1, %v231_v32, 0.0  ;;  %v267_v52 = vsel %vm193_vm1, %v239_v39, 0.0 }
  0x49   :  { %v199_v47 = vsel %vm193_vm1, %v167_v40, 0.0  ;;  %v269_v53 = vsel %vm193_vm1, %v238_v38, 0.0  ;;  %v201_v54 = vsel %vm193_vm1, %v175_v35, 0.0  ;;  %v268_v55 = vadd.f32 %v267_v52, %v266_v51 }
  0x4a   :  { %v198_v50 = vadd.f32 %v197_v42, %v196_v44  ;;  %v255_v57 = vrot.slane %v241_v48, %v157_v21  ;;  %v256_v58 = vcombine.high %v248_v49, %v248_v49  ;;  %v271_v59 = vsel %vm193_vm1, %v240_v45, 0.0 }
  0x4b   :  { %v184_v60 = vcombine.high %v182_v43, %v182_v43  ;;  %v203_v61 = vsel %vm193_vm1, %v183_v46, 0.0  ;;  %v270_v62 = vadd.f32 %v269_v53, %v268_v55  ;;  %v273_v0 = vsel %vm193_vm1, %v248_v49, 0.0 }
  0x4c   :  { %v200_v56 = vadd.f32 %v199_v47, %v198_v50  ;;  %v205_v1 = vsel %vm193_vm1, %v182_v43, 0.0  ;;  %v257_v4 = vcombine.high %v255_v57, %v255_v57  ;;  %v275_v5 = vsel %vm193_vm1, %v256_v58, 0.0 }
  0x4d   :  { %v272_v2 = vadd.f32 %v271_v59, %v270_v62  ;;  %v207_v6 = vsel %vm193_vm1, %v184_v60, 0.0  ;;  %v277_v9 = vsel %vm193_vm1, %v255_v57, 0.0 }
  0x4e   :  { %v202_v63 = vadd.f32 %v201_v54, %v200_v56  ;;  %v279_v12 = vsel %vm193_vm1, %v257_v4, 0.0 }
  0x4f   :  { %v274_v7 = vadd.f32 %v273_v0, %v272_v2 }
  0x50   :  { %v204_v3 = vadd.f32 %v203_v61, %v202_v63 }
  0x51   :  { %v276_v10 = vadd.f32 %v275_v5, %v274_v7 }
  0x52   :  { %v206_v8 = vadd.f32 %v205_v1, %v204_v3 }
  0x53   :  { %v278_v13 = vadd.f32 %v277_v9, %v276_v10 }
  0x54   :  { %v208_v11 = vadd.f32 %v207_v6, %v206_v8 }
  0x55   :  { %v280_v14 = vadd.f32 %v279_v12, %v278_v13 }
  0x56   :  { %209 = vadd.xlane.f32.xlu0 %v208_v11 }
  0x5a   :  { %281 = vadd.xlane.f32.xlu0 %v280_v14 }
  0xdf   :  { %v210_v16 = vpop.xlane.xlu0 %209 }
  0xe0   :  { %v285_v17 = vadd.f32 %v284_v15, %v210_v16 }
  0xe2   :  { %287 = vst.msk [vmem:[%s525_s5] sm:$0x3] %vm134_vm0, %v285_v17 }
  0xe3   :  { %v282_v19 = vpop.xlane.xlu0 %281 }
  0xe4   :  { %v289_v20 = vadd.f32 %v288_v18, %v282_v19 }
  0xe6   :  { %290 = vst.msk [vmem:[%s526_s6] sm:$0x3] %vm134_vm0, %v289_v20 }
  0xe7   :  { %299 = vsyncpa [#allocation3], 1 }
  0xe8   :  { %300 = vsyncpa [#allocation5], 1 }
  0xe9   :  { %301 = vsyncpa [#allocation8], 1 }

</bundles_post_ra>
